<compile_context>
chip_gen: v6e
topology: v6e:2x2x1
jax: 0.10.0
libtpu: 0.0.40
codegen_flags: <defaults>
</compile_context>

<pallas_src>
import jax
import jax.numpy as jnp
from jax.experimental import pallas as pl
from jax.experimental.pallas import tpu as pltpu

# ---- config (mirrors __C of the PyTorch module, small test sizes) ----
HIDDEN_SIZE = 32
FF_SIZE = 64

_VMEM_BUDGET_BYTES = 24 * 1024 * 1024   # conservative per-step working-set target
_VMEM_LIMIT_BYTES = 32 * 1024 * 1024    # scoped-VMEM cap (safe on v5e/v6e/v7x)


def _round_up(v, m):
    return (v + m - 1) // m * m


# --------------------------------------------------------------------------
# Fused FFN kernel:  o = relu(x @ w1 + b1) @ w2 + b2   (dropout = identity)
# --------------------------------------------------------------------------
def _make_ffn_kernel(compute_dtype):
    def _ffn_kernel(x_ref, w1_ref, b1_ref, w2_ref, b2_ref, o_ref):
        x = x_ref[...]                        # (TR, D)
        w1 = w1_ref[...]                      # (D, Fp)
        w2 = w2_ref[...]                      # (Fp, D)
        if compute_dtype is not None:         # bf16 MXU operands, f32 accumulation
            x = x.astype(compute_dtype)
            w1 = w1.astype(compute_dtype)
            w2 = w2.astype(compute_dtype)

        h = jnp.dot(x, w1, preferred_element_type=jnp.float32)
        h = h + b1_ref[...].astype(jnp.float32)
        h = jnp.maximum(h, 0.0)               # ReLU epilogue in f32 (VPU)
        # TODO(synk): nn.Dropout is identity at inference; training-mode masking
        # (pltpu.prng_seed / prng_random_bits) not implemented.
        if compute_dtype is not None:
            h = h.astype(compute_dtype)

        o = jnp.dot(h, w2, preferred_element_type=jnp.float32)
        o = o + b2_ref[...].astype(jnp.float32)
        o_ref[...] = o.astype(o_ref.dtype)

    return _ffn_kernel


# --------------------------------------------------------------------------
# Parameter helpers
# --------------------------------------------------------------------------
def pad_hidden_lane_dense(params):
    """Zero-pad the hidden (FF) dim to a multiple of 128 lanes, once, at init.

    Bit-exact: padded h columns are relu(x@0 + 0) = 0 and the matching w2 rows
    are zero, so they contribute exactly 0.0 to the output.
    """
    w1, b1, w2, b2 = params["w1"], params["b1"], params["w2"], params["b2"]
    f = w1.shape[1]
    fp = _round_up(f, 128)
    if fp != f:
        w1 = jnp.pad(w1, ((0, 0), (0, fp - f)))
        b1 = jnp.pad(b1, ((0, 0), (0, fp - f)))
        w2 = jnp.pad(w2, ((0, fp - f), (0, 0)))
    return dict(w1=w1, b1=b1, w2=w2, b2=b2)


def init_params(key, d_in=HIDDEN_SIZE, d_mid=FF_SIZE, d_out=HIDDEN_SIZE):
    k1, k2, k3, k4 = jax.random.split(key, 4)
    params = dict(
        w1=jax.random.normal(k1, (d_in, d_mid), jnp.float32) * 0.02,
        b1=jax.random.normal(k2, (1, d_mid), jnp.float32) * 0.02,
        w2=jax.random.normal(k3, (d_mid, d_out), jnp.float32) * 0.02,
        b2=jax.random.normal(k4, (1, d_out), jnp.float32) * 0.02,
    )
    return pad_hidden_lane_dense(params)     # lane-dense hidden dim, done once


# --------------------------------------------------------------------------
# Wrapper
# --------------------------------------------------------------------------
def ffn(x, params, *, row_tile=4096, use_bf16_mxu=None):
    """x: (..., D), f32 or bf16.  params: dict(w1 (D,Fp), b1 (1,Fp), w2 (Fp,D), b2 (1,D)).

    Output dtype == x.dtype (bf16 in -> bf16 out; f32 in -> f32 out).
    use_bf16_mxu=None  -> auto (bf16 MXU operands iff x is bf16)
    use_bf16_mxu=True  -> cast operands to bf16 in-kernel (f32 accumulation)
    """
    w1, b1, w2, b2 = params["w1"], params["b1"], params["w2"], params["b2"]
    D = x.shape[-1]
    if w1.shape[1] % 128 != 0:
        # Prefer doing this once at init; defensive fallback (weights are tiny /
        # constant-folded under jit).
        p = pad_hidden_lane_dense(dict(w1=w1, b1=b1, w2=w2, b2=b2))
        w1, b1, w2, b2 = p["w1"], p["b1"], p["w2"], p["b2"]
    Fp = w1.shape[1]
    lead = x.shape[:-1]

    if use_bf16_mxu is None:
        use_bf16_mxu = (x.dtype == jnp.bfloat16)
    compute_dtype = jnp.bfloat16 if use_bf16_mxu else None

    # Fold all leading dims (batch, seq) into one row axis -> one fused kernel.
    x2 = x.reshape(-1, D)
    R = x2.shape[0]

    # ---- row tile selection ----------------------------------------------
    # (a) >= 2 tiles whenever R allows, so ("parallel",) engages both v7x TCs;
    # (b) multiple of 8 sublanes;
    # (c) capped by a conservative VMEM working-set budget (double-buffered x/out
    #     tiles + double-buffered pinned weights + f32 hidden intermediate).
    x_bytes = x2.dtype.itemsize
    o_bytes = x_bytes
    w_bytes = w1.dtype.itemsize
    param_elems = D * Fp + Fp + Fp * D + D
    weight_vmem = 2 * param_elems * w_bytes           # default double-buffering

    def step_bytes(t):
        return (2 * t * D * x_bytes                   # x tile (double-buffered)
                + 2 * t * D * o_bytes                 # out tile (double-buffered)
                + t * Fp * 4                          # f32 hidden intermediate
                + weight_vmem)

    tr = max(8, min(_round_up(row_tile, 8), _round_up(max((R + 1) // 2, 8), 8)))
    while tr > 8 and step_bytes(tr) > _VMEM_BUDGET_BYTES:
        tr = _round_up(tr // 2, 8)

    grid = pl.cdiv(R, tr)   # ragged last tile handled by Pallas (no pad / no slice)

    cost = pl.CostEstimate(
        flops=4 * R * D * Fp,                         # two matmuls
        transcendentals=0,
        bytes_accessed=R * D * (x_bytes + o_bytes) + param_elems * w_bytes,
    )

    out = pl.pallas_call(
        _make_ffn_kernel(compute_dtype),
        grid=(grid,),
        in_specs=[
            pl.BlockSpec((tr, D), lambda i: (i, 0)),   # activations: tiled rows
            pl.BlockSpec((D, Fp), lambda i: (0, 0)),   # weights pinned in VMEM
            pl.BlockSpec((1, Fp), lambda i: (0, 0)),
            pl.BlockSpec((Fp, D), lambda i: (0, 0)),
            pl.BlockSpec((1, D), lambda i: (0, 0)),
        ],
        out_specs=pl.BlockSpec((tr, D), lambda i: (i, 0)),
        out_shape=jax.ShapeDtypeStruct((R, D), x2.dtype),
        compiler_params=pltpu.CompilerParams(
            dimension_semantics=("parallel",),         # row tiles -> 2 TCs on v7x
            vmem_limit_bytes=_VMEM_LIMIT_BYTES,        # v5e default (16 MiB) is too small at prod sizes
        ),
        cost_estimate=cost,
    )(x2, w1, b1, w2, b2)

    return out.reshape(*lead, D)


# --------------------------------------------------------------------------
if __name__ == "__main__":
    B, S = 2, 8
    key = jax.random.PRNGKey(0)
    kx, kp = jax.random.split(key)

    x = jax.random.normal(kx, (B, S, HIDDEN_SIZE), jnp.float32)
    params = init_params(kp)   # hidden dim already lane-dense (padded to 128)

    # Exact f32 path (matches the PyTorch forward semantics).
    y = ffn(x, params)
    jax.block_until_ready(y)

    # Pure-JAX reference (padded hidden columns contribute exactly 0).
    ref = (jnp.maximum(x @ params["w1"] + params["b1"][0], 0.0)
           @ params["w2"] + params["b2"][0])
    assert y.shape == (B, S, HIDDEN_SIZE)
    assert bool(jnp.allclose(y, ref, rtol=1e-5, atol=1e-5)), "f32 FFN mismatch"

    # bf16 end-to-end I/O (halves the dominant HBM streams); f32 accumulation.
    xb = x.astype(jnp.bfloat16)
    yb = ffn(xb, params)
    jax.block_until_ready(yb)
    assert yb.dtype == jnp.bfloat16
    assert bool(jnp.allclose(yb.astype(jnp.float32), ref, rtol=5e-2, atol=5e-2)), \
        "bf16 I/O FFN mismatch"

    # bf16 MXU operands with f32 I/O (opt-in).
    ym = ffn(x, params, use_bf16_mxu=True)
    jax.block_until_ready(ym)
    assert bool(jnp.allclose(ym, ref, rtol=5e-2, atol=5e-2)), "bf16 MXU FFN mismatch"

    print("KERNEL_OK")
</pallas_src>

<mosaic_0001>
module attributes {stable_mosaic.version = 11 : i64} {
  func.func @_ffn_kernel(%arg0: i32, %arg1: memref<8x32xf32, #tpu.memory_space<vmem>>, %arg2: memref<32x128xf32, #tpu.memory_space<vmem>>, %arg3: memref<1x128xf32, #tpu.memory_space<vmem>>, %arg4: memref<128x32xf32, #tpu.memory_space<vmem>>, %arg5: memref<1x32xf32, #tpu.memory_space<vmem>>, %arg6: memref<8x32xf32, #tpu.memory_space<vmem>>) attributes {dimension_semantics = [#tpu.dimension_semantics<parallel>], iteration_bounds = array<i64: 2>, scalar_prefetch = 0 : i64, scratch_operands = 0 : i64, tpu.core_type = #tpu.core_type<tc>, window_params = [{transform_indices = @transform_0, window_bounds = array<i64: 8, 32>}, {pipeline_mode = #tpu.pipeline_mode<synchronous>, transform_indices = @transform_1, window_bounds = array<i64: 32, 128>}, {pipeline_mode = #tpu.pipeline_mode<synchronous>, transform_indices = @transform_2, window_bounds = array<i64: 1, 128>}, {pipeline_mode = #tpu.pipeline_mode<synchronous>, transform_indices = @transform_3, window_bounds = array<i64: 128, 32>}, {pipeline_mode = #tpu.pipeline_mode<synchronous>, transform_indices = @transform_4, window_bounds = array<i64: 1, 32>}, {transform_indices = @transform_5, window_bounds = array<i64: 8, 32>}]} {
    %c0 = arith.constant 0 : index
    %c0_0 = arith.constant 0 : index
    %0 = vector.load %arg1[%c0, %c0_0] : memref<8x32xf32, #tpu.memory_space<vmem>>, vector<8x32xf32>
    %c0_1 = arith.constant 0 : index
    %c0_2 = arith.constant 0 : index
    %1 = vector.load %arg2[%c0_1, %c0_2] : memref<32x128xf32, #tpu.memory_space<vmem>>, vector<32x128xf32>
    %c0_3 = arith.constant 0 : index
    %c0_4 = arith.constant 0 : index
    %2 = vector.load %arg4[%c0_3, %c0_4] : memref<128x32xf32, #tpu.memory_space<vmem>>, vector<128x32xf32>
    %cst = arith.constant dense<0.000000e+00> : vector<8x128xf32>
    %3 = tpu.matmul %0, %1, %cst {dimension_numbers = #tpu.dot_dimension_numbers<[1], [0], [0], [1], [0, 0, 1, 1], [], []>} : vector<8x32xf32>, vector<32x128xf32>, vector<8x128xf32> -> vector<8x128xf32>
    %c0_5 = arith.constant 0 : index
    %c0_6 = arith.constant 0 : index
    %4 = vector.load %arg3[%c0_5, %c0_6] : memref<1x128xf32, #tpu.memory_space<vmem>>, vector<1x128xf32>
    %5 = vector.broadcast %4 : vector<1x128xf32> to vector<8x128xf32>
    %6 = arith.addf %3, %5 : vector<8x128xf32>
    %cst_7 = arith.constant 0.000000e+00 : f32
    %7 = vector.broadcast %cst_7 : f32 to vector<8x128xf32>
    %8 = arith.maximumf %6, %7 : vector<8x128xf32>
    %cst_8 = arith.constant dense<0.000000e+00> : vector<8x32xf32>
    %9 = tpu.matmul %8, %2, %cst_8 {dimension_numbers = #tpu.dot_dimension_numbers<[1], [0], [0], [1], [0, 0, 1, 1], [], []>} : vector<8x128xf32>, vector<128x32xf32>, vector<8x32xf32> -> vector<8x32xf32>
    %c0_9 = arith.constant 0 : index
    %c0_10 = arith.constant 0 : index
    %10 = vector.load %arg5[%c0_9, %c0_10] : memref<1x32xf32, #tpu.memory_space<vmem>>, vector<1x32xf32>
    %11 = vector.broadcast %10 : vector<1x32xf32> to vector<8x32xf32>
    %12 = arith.addf %9, %11 : vector<8x32xf32>
    %c0_11 = arith.constant 0 : index
    %c0_12 = arith.constant 0 : index
    %13 = vector.load %arg6[%c0_11, %c0_12] : memref<8x32xf32, #tpu.memory_space<vmem>>, vector<8x32xf32>
    tpu.vector_store %arg6[%c0_11, %c0_12], %12 {strides = array<i32>} : memref<8x32xf32, #tpu.memory_space<vmem>>, vector<8x32xf32>,
    return
  }
  func.func @transform_0(%arg0: i32) -> (i32, i32) {
    %c0_i32 = arith.constant 0 : i32
    %c0_i32_0 = arith.constant 0 : i32
    return %arg0, %c0_i32 : i32, i32
  }
  func.func @transform_1(%arg0: i32) -> (i32, i32) {
    %c0_i32 = arith.constant 0 : i32
    %c0_i32_0 = arith.constant 0 : i32
    %c0_i32_1 = arith.constant 0 : i32
    return %c0_i32, %c0_i32_0 : i32, i32
  }
  func.func @transform_2(%arg0: i32) -> (i32, i32) {
    %c0_i32 = arith.constant 0 : i32
    %c0_i32_0 = arith.constant 0 : i32
    %c0_i32_1 = arith.constant 0 : i32
    return %c0_i32, %c0_i32_0 : i32, i32
  }
  func.func @transform_3(%arg0: i32) -> (i32, i32) {
    %c0_i32 = arith.constant 0 : i32
    %c0_i32_0 = arith.constant 0 : i32
    %c0_i32_1 = arith.constant 0 : i32
    return %c0_i32, %c0_i32_0 : i32, i32
  }
  func.func @transform_4(%arg0: i32) -> (i32, i32) {
    %c0_i32 = arith.constant 0 : i32
    %c0_i32_0 = arith.constant 0 : i32
    %c0_i32_1 = arith.constant 0 : i32
    return %c0_i32, %c0_i32_0 : i32, i32
  }
  func.func @transform_5(%arg0: i32) -> (i32, i32) {
    %c0_i32 = arith.constant 0 : i32
    %c0_i32_0 = arith.constant 0 : i32
    return %arg0, %c0_i32 : i32, i32
  }
}

</mosaic_0001>

<bundles_post_ra>
// kernel: tpu_custom_call.1
= control target key start
LH: loop header
LB: loop body
LE: loop exit
PB: predicated region body
PF: predicated region fallthrough
CT: control target
= control target key end

     0   :  { %10 = vsyncpa [#allocation3], 0  ;;  %s876_s0 = inlined_call_operand.vmem [shape: f32[16,32], index: 0, kind: input, shape index: {}]   ;;  %s877_s1 = inlined_call_operand.vmem [shape: f32[32,128], index: 1, kind: input, shape index: {}]   ;;  %s878_s2 = inlined_call_operand.vmem [shape: f32[1,128], index: 2, kind: input, shape index: {}]   ;;  %s879_s3 = inlined_call_operand.vmem [shape: f32[128,32], index: 3, kind: input, shape index: {}]   ;;  %s880_s4 = inlined_call_operand.vmem [shape: f32[1,32], index: 4, kind: input, shape index: {}]   ;;  %s881_s5 = inlined_call_operand.hbm [shape: f32[16,32], index: 5, kind: output, shape index: {}]  }
   0x1   :  { %12 = vsyncpa [#allocation3 + $0x1], 0  ;;  %s691_s18 = smov 0   ;;  %s693_s19 = smov 0  }
   0x2   :  { %s695_s20 = smov 0   ;;  %s697_s21 = smov 0  }
   0x3 LB: > { %s712_s22 = sadd.s32 4294967295, %s656_s21   ;;  %s474_s23 = sadd.s32 4294967294, %s656_s21   ;;  %s656_s21 = sphi %s697_s21, %s887_s21   ;;  %s652_s20 = sphi %s695_s20, %s886_s20   ;;  %s648_s19 = sphi %s693_s19, %s885_s19   ;;  %s644_s18 = sphi %s691_s18, %s884_s18  }
   0x4   : > { %s716_s24 = sadd.s32 1, %s656_s21   ;;  %s135_s25 = sadd.s32 1, %s652_s20 }
   0x5   : > { %s132_s26 = ssub.s32 %s656_s21, %s716_s24  ;;  %p145_p0 = scmp.ne.s32.totalorder %s652_s20, %s648_s19 }
   0x6   : > { %p133_p1 = scmp.eq.s32.totalorder %s132_s26, 0  ;;  %p146_p2 = scmp.eq.s32.totalorder %s712_s22, 1 }
   0x7   : > { %p151_p3 = scmp.ne.s32.totalorder %s648_s19, %s644_s18  ;;  %p152_p4 = scmp.eq.s32.totalorder %s474_s23, 1 }
   0x8   : > { %s727_s27 = scalar_select %p133_p1, %s652_s20, %s135_s25  }
   0x9   : > { %p729_p5 = por %p146_p2, %p145_p0  ;;  %p733_p6 = por %p152_p4, %p151_p3 }
   0xa   : > { %p477_p7 = scmp.ge.s32.totalorder %s656_s21, 1  ;;  %p189_p8 = scmp.lt.s32.totalorder %s656_s21, 3 }
   0xc   : > { %p190_p9 = pnand %p477_p7, %p189_p8 }
   0xd   : > { %p216_p10 = scmp.lt.s32.totalorder (!%p190_p9), %s712_s22, 1  ;;  %s213_s26 = sand.u32 (!%p190_p9), 1, %s648_s19  }
   0xe   : > { %193 = sbr.rel (%p190_p9) target bundleno = 433 (0x1b1), region = 40  ;;  %s478_s30 = sshll.u32 (!%p190_p9), %s213_s26, 3 }
   0xf   : > { %s484_s8 = sshll.u32 (!%p190_p9), %s712_s22, 7  ;;  %s215_s9 = scalar_lea.vmem (!%p190_p9), [#allocation2], %s478_s30 }
  0x10   : > { %s415_s10 = sshll.u32 (!%p190_p9), %s215_s9, 4  ;;  %s840_s13 = scalar_lea.hbm (!%p190_p9), %s881_s5, %s484_s8  ;;  %s416_s10 = int_to_ptr.vmem [resolvable:$true] %s415_s10 }
  0x11   : > { %s402_s14 = scalar_lea.sflag (!%p190_p9), [#allocation3], %s213_s26  ;;  %s596_s15 = scalar_lea.vmem (!%p190_p9), %s416_s10, 128 }
  0x12   : > { %p597_p11 = scmp.ne.s32.totalorder (!%p190_p9), %s416_s10, %s596_s15 }
  0x13   : > { %v224_v0 = vld [vmem:[%s877_s1 + $0x18] sm:$0xff]  ;;  %v658_v1 = vmov 0.0   ;;  %v223_v2 = vld [vmem:[%s877_s1 + $0x10] sm:$0xff]  ;;  %vm659_vm0 = vmmov 0   ;;  %s217_s11 = scalar_select %p216_p10, %s712_s22, 1  ;;  %v222_v5 = vld [vmem:[%s877_s1 + $0x8] sm:$0xff] }
  0x14   : > { %509 = vmatprep.subr.mxu0 %v658_v1  ;;  %517 = vmatprep.mubr.msk.f32.mxu0 %vm659_vm0, %v658_v1  ;;  %v240_v3 = vld [vmem:[%s879_s3 + $0x78] sm:$0xff]  ;;  %v239_v4 = vld [vmem:[%s879_s3 + $0x70] sm:$0xff]  ;;  %v238_v6 = vld [vmem:[%s879_s3 + $0x68] sm:$0xff]  ;;  %vm248_vm1 = vcmask 261120   ;;  %p598_p12 = pnand %p597_p11, %p729_p5  ;;  %s660_s22 = smov [#allocation2]  }
  0x15   : > { %510 = vmatpush3.msra.mxu0 %v224_v0  ;;  %520 = vmatprep.subr.mxu1 %v658_v1  ;;  %s479_s16 = sshll.u32 %s217_s11, 3  ;;  %v221_v7 = vld [vmem:[%s877_s1] sm:$0xff]  ;;  %v236_v10 = vld [vmem:[%s879_s3 + $0x58] sm:$0xff]  ;;  %v235_v11 = vld [vmem:[%s879_s3 + $0x50] sm:$0xff] }
  0x16   : > { %511 = vmatprep.subr.mxu0 %v658_v1  ;;  %521 = vmatpush3.msra.mxu1 %v240_v3  ;;  %s219_s7 = scalar_lea.vmem %s876_s0, %s479_s16  ;;  %v237_v9 = vld [vmem:[%s879_s3 + $0x60] sm:$0xff]  ;;  %v234_v12 = vld [vmem:[%s879_s3 + $0x48] sm:$0xff]  ;;  %v232_v14 = vld [vmem:[%s879_s3 + $0x38] sm:$0xff]  ;;  %p599_p13 = pneg %p598_p12 }
  0x17   : > { %512 = vmatpush3.msra.mxu0 %v223_v2  ;;  %522 = vmatprep.subr.mxu1 %v658_v1  ;;  %v220_v8 = vld [vmem:[%s219_s7] sm:$0xff]  ;;  %v231_v15 = vld [vmem:[%s879_s3 + $0x30] sm:$0xff]  ;;  %v230_v16 = vld [vmem:[%s879_s3 + $0x28] sm:$0xff]  ;;  %s600_s16 = sshll.u32 %s660_s22, 4  ;;  %s601_s16 = int_to_ptr.vmem [resolvable:$false] %s600_s16 }
  0x18   : > { %513 = vmatprep.subr.mxu0 %v658_v1  ;;  %523 = vmatpush3.msra.mxu1 %v239_v4  ;;  %v233_v13 = vld [vmem:[%s879_s3 + $0x40] sm:$0xff]  ;;  %v228_v18 = vld [vmem:[%s879_s3 + $0x18] sm:$0xff]  ;;  %v227_v19 = vld [vmem:[%s879_s3 + $0x10] sm:$0xff]  ;;  %s602_s17 = scalar_lea.vmem %s601_s16, 256  ;;  %p603_p0 = scmp.lt.s32.totalorder %s416_s10, %s601_s16 }
  0x19   : > { %514 = vmatpush3.msra.mxu0 %v222_v5  ;;  %524 = vmatprep.subr.mxu1 %v658_v1  ;;  %v229_v17 = vld [vmem:[%s879_s3 + $0x20] sm:$0xff]  ;;  %v226_v20 = vld [vmem:[%s879_s3 + $0x8] sm:$0xff]  ;;  %p604_p1 = scmp.lt.s32.totalorder %s602_s17, %s596_s15 }
  0x1a   : > { %515 = vmatprep.subr.mxu0 %v658_v1  ;;  %525 = vmatpush3.msra.mxu1 %v238_v6  ;;  %v225_v21 = vld [vmem:[%s879_s3] sm:$0xff] }
  0x1b   : > { %516 = vmatpush3.msra.mxu0 %v221_v7  ;;  %526 = vmatprep.subr.mxu1 %v658_v1  ;;  %v480_v22 = vld [vmem:[%s878_s2] ss:$0 sm:$0xff]  ;;  %p605_p2 = por %p604_p1, %p603_p0 }
  0x1c   : > { %518 = vmatmul.mubr.msk.f32.vlgmr.msra.gmra.mxu0 %vm248_vm1, %v220_v8  ;;  %527 = vmatpush3.msra.mxu1 %v237_v9  ;;  %v482_v27 = vld [vmem:[%s880_s4] ss:$0 sm:$0xff] }
  0x1d   : > { %528 = vmatprep.subr.mxu1 %v658_v1  ;;  %552 = vmatprep.mubr.msk.f32.mxu1 %vm659_vm0, %v658_v1  ;;  %p606_p3 = pnand %p605_p2, %p599_p13 }
  0x1e   : > { %529 = vmatpush3.msra.mxu1 %v236_v10 }
  0x1f   : > { %530 = vmatprep.subr.mxu1 %v658_v1 }
  0x20   : > { %531 = vmatpush3.msra.mxu1 %v235_v11 }
  0x21   : > { %532 = vmatprep.subr.mxu1 %v658_v1 }
  0x22   : > { %533 = vmatpush3.msra.mxu1 %v234_v12 }
  0x23   : > { %534 = vmatprep.subr.mxu1 %v658_v1 }
  0x24   : > { %535 = vmatpush3.msra.mxu1 %v233_v13 }
  0x25   : > { %536 = vmatprep.subr.mxu1 %v658_v1 }
  0x26   : > { %537 = vmatpush3.msra.mxu1 %v232_v14 }
  0x27   : > { %538 = vmatprep.subr.mxu1 %v658_v1 }
  0x28   : > { %539 = vmatpush3.msra.mxu1 %v231_v15 }
  0x29   : > { %540 = vmatprep.subr.mxu1 %v658_v1 }
  0x2a   : > { %541 = vmatpush3.msra.mxu1 %v230_v16 }
  0x2b   : > { %542 = vmatprep.subr.mxu1 %v658_v1 }
  0x2c   : > { %543 = vmatpush3.msra.mxu1 %v229_v17 }
  0x2d   : > { %544 = vmatprep.subr.mxu1 %v658_v1 }
  0x2e   : > { %545 = vmatpush3.msra.mxu1 %v228_v18 }
  0x2f   : > { %546 = vmatprep.subr.mxu1 %v658_v1 }
  0x30   : > { %547 = vmatpush3.msra.mxu1 %v227_v19 }
  0x31   : > { %548 = vmatprep.subr.mxu1 %v658_v1 }
  0x32   : > { %549 = vmatpush3.msra.mxu1 %v226_v20 }
  0x33   : > { %550 = vmatprep.subr.mxu1 %v658_v1 }
  0x34   : > { %551 = vmatpush3.msra.mxu1 %v225_v21 }
  0xdc   : > { %v318_v23 = vpop.f32.mrf.mxu0 }
  0xdd   : > { %v319_v24 = vadd.f32 %v480_v22, %v318_v23 }
  0xde   : > { %v519_v25 = vpop.f32.mrf.mxu0 }
  0xdf   : > { %v322_v26 = vmax.f32 %v319_v24, 0.0 }
  0xe1   : > { %553 = vmatmul.mubr.f32.vlgmr.msra.gmra.mxu1 %v322_v26 }
 0x1a1   : > { %v396_v28 = vpop.f32.mrf.mxu1 }
 0x1a2   : > { %v397_v29 = vadd.f32 %v482_v27, %v396_v28 }
 0x1a3   : > { %v554_v30 = vpop.f32.mrf.mxu1 }
 0x1a4   : > { %400 = vst.msk [vmem:[%s215_s9] sm:$0xff] %vm248_vm1, %v397_v29 }
 0x1a5   : > { %609 = shalt.err (!%p606_p3)
}
 0x1a6   : > { %s610_s23 = scalar_lea.hbm %s840_s13, 128  ;;  %s614_s30 = scalar_lea.hbm %s881_s5, 256 }
 0x1a7   : > { %p611_p4 = scmp.ne.s32.totalorder %s840_s13, %s610_s23  ;;  %p615_p9 = scmp.lt.s32.totalorder %s840_s13, %s881_s5 }
 0x1a8   : > { %p616_p10 = scmp.lt.s32.totalorder %s614_s30, %s610_s23 }
 0x1a9   : > { %p612_p7 = pnand %p611_p4, %p729_p5 }
 0x1aa   : > { %p617_p11 = por %p616_p10, %p615_p9 }
 0x1ab   : > { %p613_p8 = pneg %p612_p7 }
 0x1ad   : > { %p618_p12 = pnand %p617_p11, %p613_p8 }
 0x1af   : > { %621 = shalt.err (!%p618_p12)
}
 0x1b0   : > { %555 = dma.vmem_to_hbm [thread:$0]  (%p729_p5), %s416_s10, 128, %s840_s13, %s402_s14  }
 0x1b1 PF: > { %p561_p13 = scmp.ge.s32.totalorder %s656_s21, 2  ;;  %s427_s8 = sand.u32 1, %s644_s18  }
 0x1b2   : > { %s428_s9 = scalar_lea.sflag [#allocation3], %s427_s8 }
 0x1b3   : > { %p558_p0 = pnand %p561_p13, %p733_p6 }
 0x1b5   : > { %p559_p1 = pneg %p558_p0 }
 0x1b7   : > { %639 = dma.done.wait (%p559_p1), %s428_s9, 128  }
 0x1b8   : > { %641 = vsyncadd (%p559_p1), %s428_s9, 4294967168  ;;  %p15_p2 = scmp.ge.s32.totalorder %s716_s24, 4   ;;  %s884_s18 = smov %s648_s19 }
 0x1b9   : > { %s885_s19 = smov %s652_s20  ;;  %s886_s20 = smov %s727_s27 }
 0x1ba   : > { %s887_s21 = smov %s716_s24  ;;  %17 = sbr.rel (!%p15_p2) target bundleno = 3 (0x3), region = 75 }
 0x1bf   :  { %433 = vsyncpa [#allocation3], 1 }
 0x1c0   :  { %435 = vsyncpa [#allocation3 + $0x1], 1 }

</bundles_post_ra>
